<compile_context>
chip_gen: v5e
topology: v5e:2x2
jax: 0.10.0
libtpu: 0.0.40
codegen_flags: <defaults>
</compile_context>

<pallas_src>
import jax
import jax.numpy as jnp
from jax.experimental import pallas as pl
from jax.experimental.pallas import tpu as pltpu


def _round_up(x, m):
  return ((x + m - 1) // m) * m


def _cdiv(a, b):
  return (a + b - 1) // b


def _vmem_budget_bytes():
  """Generation-aware per-TensorCore VMEM budget (headroom for Mosaic scratch)."""
  cap = None
  try:
    cap = int(pltpu.get_tpu_info().vmem_capacity_bytes)
  except Exception:
    cap = None
  kind = ""
  try:
    kind = jax.devices()[0].device_kind.lower()
  except Exception:
    pass
  if cap is None:
    cap = 128 * 2**20 if ("v5" in kind or "v6" in kind) else 64 * 2**20
  if "7" in kind:                       # v7x: 64 MiB physical per TensorCore
    cap = min(cap, 64 * 2**20)
  return max(cap - 16 * 2**20, (cap * 3) // 4)   # ~48 MiB v7x, ~112 MiB v5e/v6e


def _vmem_estimate(be, tn, dout_pad, dp, itemsize, onehot_bytes, has_prev):
  est = 2 * tn * dout_pad * itemsize            # table chunk (double-buffered)
  est += 2 * be * dout_pad * itemsize           # output block (double-buffered)
  est += 2 * be * 128 * 4                       # (be,1) int32 idx block, lane-padded
  if has_prev:
    est += 2 * be * _round_up(dp, 128) * itemsize
  est += be * tn * onehot_bytes                 # in-kernel one-hot temporary
  est += be * dout_pad * 4                      # f32 matmul result
  est += 2 * 2**20                              # Mosaic internal scratch slack
  return est


def _pick_tiles(E, N, dout_pad, dp, itemsize, onehot_bytes, has_prev,
                block_e, table_block, budget):
  be = max(8, min(_round_up(block_e, 8), _round_up(E, 8)))
  tn = _round_up(N, 8)
  if table_block is not None:
    tn = max(8, min(tn, _round_up(table_block, 8)))
  while _vmem_estimate(be, tn, dout_pad, dp, itemsize, onehot_bytes,
                       has_prev) > budget:
    if tn > 512:
      tn = _round_up(tn // 2, 8)
    elif be > 64:
      be = _round_up(be // 2, 8)
    elif tn > 8:
      tn = _round_up(tn // 2, 8)
    elif be > 8:
      be = _round_up(be // 2, 8)
    else:
      break
  return be, tn


def _make_unpool_kernel(has_prev, dp):
  def kernel(*refs):
    if has_prev:
      idx_ref, table_ref, prev_ref, out_ref = refs
    else:
      idx_ref, table_ref, out_ref = refs

    k = pl.program_id(1)
    last_k = pl.num_programs(1) - 1
    tn = table_ref.shape[0]
    be = idx_ref.shape[0]

    table = table_ref[...]
    if not jnp.issubdtype(table.dtype, jnp.floating):
      table = table.astype(jnp.float32)     # rare integer path (exact < 2^24)

    # One-hot selection block in the table's own dtype: 0/1 weights are exact
    # in any float dtype; accumulation happens in f32 on the MXU.
    col = jax.lax.broadcasted_iota(jnp.int32, (be, tn), 1) + k * tn
    onehot = (col == idx_ref[...]).astype(table.dtype)
    contrib = jnp.dot(onehot, table, preferred_element_type=jnp.float32)
    contrib = contrib.astype(out_ref.dtype)

    @pl.when(k == 0)
    def _():
      out_ref[...] = contrib                 # single full lane-dense store

    @pl.when(k > 0)
    def _():
      # Each output element receives exactly one nonzero contribution across
      # all table chunks, so accumulating in the output dtype is exact.
      out_ref[...] = out_ref[...] + contrib

    if has_prev:
      @pl.when(k == last_k)
      def _():
        # Fused concat: lanes [0, dp) hold exact zeros from the zero-padded
        # table columns; overwrite them with msg_prev (tiny VMEM store).
        out_ref[:, :dp] = prev_ref[...].astype(out_ref.dtype)

  return kernel


def unpooling_module(msg, msg_prev, edge_idx, *, block_e=1024, table_block=None):
  """Pallas equivalent of UnpoolingModule.forward."""
  idx = edge_idx[1].astype(jnp.int32)
  E = int(idx.shape[0])
  N, D = (int(s) for s in msg.shape)

  has_prev = msg_prev is not None and int(msg_prev.shape[-1]) > 0
  dp = int(msg_prev.shape[-1]) if has_prev else 0
  dout = dp + D
  dout_pad = _round_up(dout, 128)            # lane-dense output blocks

  out_dtype = jnp.result_type(msg, msg_prev) if has_prev else msg.dtype
  msg_c = msg if msg.dtype == out_dtype else msg.astype(out_dtype)
  itemsize = jnp.dtype(out_dtype).itemsize
  onehot_bytes = itemsize if jnp.issubdtype(out_dtype, jnp.floating) else 4

  budget = _vmem_budget_bytes()
  be, tn = _pick_tiles(E, N, dout_pad, dp, itemsize, onehot_bytes, has_prev,
                       block_e, table_block, budget)
  # TODO(synk): for very large N (past the one-hot-MXU break-even: ~500 rows
  # f32 on v5e, ~1300 on v6e, ~600 on v7x; halve for bf16) switch to a
  # scalar-prefetch / manual-DMA row-gather path instead of chunked matmuls.

  e_pad = _cdiv(E, be) * be
  n_pad = _cdiv(N, tn) * tn

  # Table padded to lane-dense width with msg at columns [dp, dp + D), so the
  # matmul output already sits at its final lane offset (zeros elsewhere).
  table_p = jnp.pad(msg_c, ((0, n_pad - N), (dp, dout_pad - dp - D)))

  idx_p = jnp.pad(idx, (0, e_pad - E)) if e_pad != E else idx
  idx_2d = idx_p.reshape(e_pad, 1)

  inputs = [idx_2d, table_p]
  in_specs = [
      pl.BlockSpec((be, 1), lambda e, k: (e, 0)),
      # Constant e-index: Pallas elides re-DMA when the block index repeats;
      # the 2x (double-buffer) footprint is accounted for in the estimate.
      # TODO(synk): pipeline_mode=pl.Buffered(1) would halve the table VMEM.
      pl.BlockSpec((tn, dout_pad), lambda e, k: (k, 0)),
  ]
  if has_prev:
    prev_c = msg_prev if msg_prev.dtype == out_dtype else msg_prev.astype(out_dtype)
    prev_p = jnp.pad(prev_c, ((0, e_pad - E), (0, 0))) if e_pad != E else prev_c
    inputs.append(prev_p)
    in_specs.append(pl.BlockSpec((be, dp), lambda e, k: (e, 0)))

  est = _vmem_estimate(be, tn, dout_pad, dp, itemsize, onehot_bytes, has_prev)
  vmem_limit = int(min(budget, max(est + (4 << 20), 32 << 20)))

  out = pl.pallas_call(
      _make_unpool_kernel(has_prev, dp),
      grid=(e_pad // be, n_pad // tn),
      in_specs=in_specs,
      out_specs=pl.BlockSpec((be, dout_pad), lambda e, k: (e, 0)),
      out_shape=jax.ShapeDtypeStruct((e_pad, dout_pad), out_dtype),
      compiler_params=pltpu.CompilerParams(
          dimension_semantics=("parallel", "arbitrary"),
          vmem_limit_bytes=vmem_limit),
  )(*inputs)

  if e_pad == E and dout_pad == dout:
    return out
  return out[:E, :dout]


if __name__ == "__main__":
  key = jax.random.PRNGKey(0)
  k1, k2, k3 = jax.random.split(key, 3)

  N, D = 16, 32        # msg: node features
  Dp = 16              # msg_prev: per-edge features
  E = 24               # number of edges (no divisibility requirement)

  msg = jax.random.normal(k1, (N, D), dtype=jnp.float32)
  msg_prev = jax.random.normal(k2, (E, Dp), dtype=jnp.float32)
  gidx = jax.random.randint(k3, (E,), 0, N, dtype=jnp.int32)
  edge_idx = jnp.stack([jnp.arange(E, dtype=jnp.int32), gidx], axis=0)

  # ---- with msg_prev (fused-concat path) ----
  out = jax.block_until_ready(unpooling_module(msg, msg_prev, edge_idx))
  ref = jnp.concatenate([msg_prev, msg[gidx]], axis=-1)
  assert out.shape == (E, Dp + D)
  assert jnp.allclose(out, ref, atol=1e-5, rtol=1e-5), "concat path mismatch"

  # ---- without msg_prev (gather-only path) ----
  out2 = jax.block_until_ready(unpooling_module(msg, None, edge_idx))
  assert out2.shape == (E, D)
  assert jnp.allclose(out2, msg[gidx], atol=1e-5, rtol=1e-5), "gather mismatch"

  # ---- chunked-table path (table blocked along N) + non-divisible E block ----
  out3 = jax.block_until_ready(
      unpooling_module(msg, msg_prev, edge_idx, block_e=16, table_block=8))
  assert jnp.allclose(out3, ref, atol=1e-5, rtol=1e-5), "chunked-table mismatch"

  # ---- bf16 path (exercises bf16 one-hot operands, exact selection) ----
  msg_bf = msg.astype(jnp.bfloat16)
  prev_bf = msg_prev.astype(jnp.bfloat16)
  out4 = jax.block_until_ready(unpooling_module(msg_bf, prev_bf, edge_idx))
  ref4 = jnp.concatenate([prev_bf, msg_bf[gidx]], axis=-1)
  assert out4.dtype == jnp.bfloat16
  assert jnp.allclose(out4.astype(jnp.float32), ref4.astype(jnp.float32)), \
      "bf16 path mismatch"

  # ---- larger, non-divisible E to exercise padding + bigger blocks ----
  E2 = 1000
  idx2 = jax.random.randint(jax.random.PRNGKey(7), (E2,), 0, N, dtype=jnp.int32)
  edge_idx2 = jnp.stack([jnp.arange(E2, dtype=jnp.int32), idx2], axis=0)
  out5 = jax.block_until_ready(unpooling_module(msg, None, edge_idx2, block_e=512))
  assert out5.shape == (E2, D)
  assert jnp.allclose(out5, msg[idx2], atol=1e-5, rtol=1e-5), "tail mismatch"

  print("KERNEL_OK")
</pallas_src>

<mosaic_0001>
module attributes {stable_mosaic.version = 11 : i64} {
  func.func @kernel(%arg0: i32, %arg1: i32, %arg2: memref<24x1xi32, #tpu.memory_space<vmem>>, %arg3: memref<16x128xf32, #tpu.memory_space<vmem>>, %arg4: memref<24x16xf32, #tpu.memory_space<vmem>>, %arg5: memref<24x128xf32, #tpu.memory_space<vmem>>) attributes {dimension_semantics = [#tpu.dimension_semantics<parallel>, #tpu.dimension_semantics<arbitrary>], iteration_bounds = array<i64: 1, 1>, scalar_prefetch = 0 : i64, scratch_operands = 0 : i64, tpu.core_type = #tpu.core_type<tc>, window_params = [{transform_indices = @transform_0, window_bounds = array<i64: 24, 1>}, {transform_indices = @transform_1, window_bounds = array<i64: 16, 128>}, {transform_indices = @transform_2, window_bounds = array<i64: 24, 16>}, {transform_indices = @transform_3, window_bounds = array<i64: 24, 128>}]} {
    %c0 = arith.constant 0 : index
    %c0_0 = arith.constant 0 : index
    %0 = vector.load %arg3[%c0, %c0_0] : memref<16x128xf32, #tpu.memory_space<vmem>>, vector<16x128xf32>
    %1 = tpu.iota {dimensions = array<i32: 1>} : vector<24x16xi32>
    %c16_i32 = arith.constant 16 : i32
    %2 = arith.muli %arg1, %c16_i32 : i32
    %3 = vector.broadcast %2 : i32 to vector<24x16xi32>
    %4 = arith.addi %1, %3 : vector<24x16xi32>
    %c0_1 = arith.constant 0 : index
    %c0_2 = arith.constant 0 : index
    %5 = vector.load %arg2[%c0_1, %c0_2] : memref<24x1xi32, #tpu.memory_space<vmem>>, vector<24x1xi32>
    %6 = vector.broadcast %5 : vector<24x1xi32> to vector<24x16xi32>
    %7 = arith.cmpi eq, %4, %6 : vector<24x16xi32>
    %8 = arith.extui %7 : vector<24x16xi1> to vector<24x16xi32>
    %9 = arith.sitofp %8 : vector<24x16xi32> to vector<24x16xf32>
    %cst = arith.constant dense<0.000000e+00> : vector<24x128xf32>
    %10 = tpu.matmul %9, %0, %cst {dimension_numbers = #tpu.dot_dimension_numbers<[1], [0], [0], [1], [0, 0, 1, 1], [], []>} : vector<24x16xf32>, vector<16x128xf32>, vector<24x128xf32> -> vector<24x128xf32>
    %c0_i32 = arith.constant 0 : i32
    %11 = arith.cmpi eq, %arg1, %c0_i32 : i32
    %12 = arith.extui %11 : i1 to i32
    %c0_i32_3 = arith.constant 0 : i32
    %13 = arith.cmpi ne, %12, %c0_i32_3 : i32
    scf.if %13 {
      %c0_8 = arith.constant 0 : index
      %c0_9 = arith.constant 0 : index
      %20 = vector.load %arg5[%c0_8, %c0_9] : memref<24x128xf32, #tpu.memory_space<vmem>>, vector<24x128xf32>
      tpu.vector_store %arg5[%c0_8, %c0_9], %10 {strides = array<i32>} : memref<24x128xf32, #tpu.memory_space<vmem>>, vector<24x128xf32>,
    } else {
    }
    %c0_i32_4 = arith.constant 0 : i32
    %14 = arith.cmpi sgt, %arg1, %c0_i32_4 : i32
    %15 = arith.extui %14 : i1 to i32
    %c0_i32_5 = arith.constant 0 : i32
    %16 = arith.cmpi ne, %15, %c0_i32_5 : i32
    scf.if %16 {
      %c0_8 = arith.constant 0 : index
      %c0_9 = arith.constant 0 : index
      %20 = vector.load %arg5[%c0_8, %c0_9] : memref<24x128xf32, #tpu.memory_space<vmem>>, vector<24x128xf32>
      %21 = arith.addf %20, %10 : vector<24x128xf32>
      %c0_10 = arith.constant 0 : index
      %c0_11 = arith.constant 0 : index
      %22 = vector.load %arg5[%c0_10, %c0_11] : memref<24x128xf32, #tpu.memory_space<vmem>>, vector<24x128xf32>
      tpu.vector_store %arg5[%c0_10, %c0_11], %21 {strides = array<i32>} : memref<24x128xf32, #tpu.memory_space<vmem>>, vector<24x128xf32>,
    } else {
    }
    %c0_i32_6 = arith.constant 0 : i32
    %17 = arith.cmpi eq, %arg1, %c0_i32_6 : i32
    %18 = arith.extui %17 : i1 to i32
    %c0_i32_7 = arith.constant 0 : i32
    %19 = arith.cmpi ne, %18, %c0_i32_7 : i32
    scf.if %19 {
      %c0_8 = arith.constant 0 : index
      %c0_9 = arith.constant 0 : index
      %20 = vector.load %arg4[%c0_8, %c0_9] : memref<24x16xf32, #tpu.memory_space<vmem>>, vector<24x16xf32>
      %c0_10 = arith.constant 0 : index
      %c0_11 = arith.constant 0 : index
      %21 = vector.load %arg5[%c0_10, %c0_11] : memref<24x128xf32, #tpu.memory_space<vmem>>, vector<24x16xf32>
      tpu.vector_store %arg5[%c0_10, %c0_11], %20 {strides = array<i32>} : memref<24x128xf32, #tpu.memory_space<vmem>>, vector<24x16xf32>,
    } else {
    }
    return
  }
  func.func @transform_0(%arg0: i32, %arg1: i32) -> (i32, i32) {
    %c0_i32 = arith.constant 0 : i32
    %c0_i32_0 = arith.constant 0 : i32
    return %arg0, %c0_i32 : i32, i32
  }
  func.func @transform_1(%arg0: i32, %arg1: i32) -> (i32, i32) {
    %c0_i32 = arith.constant 0 : i32
    %c0_i32_0 = arith.constant 0 : i32
    return %arg1, %c0_i32 : i32, i32
  }
  func.func @transform_2(%arg0: i32, %arg1: i32) -> (i32, i32) {
    %c0_i32 = arith.constant 0 : i32
    %c0_i32_0 = arith.constant 0 : i32
    return %arg0, %c0_i32 : i32, i32
  }
  func.func @transform_3(%arg0: i32, %arg1: i32) -> (i32, i32) {
    %c0_i32 = arith.constant 0 : i32
    %c0_i32_0 = arith.constant 0 : i32
    return %arg0, %c0_i32 : i32, i32
  }
}

</mosaic_0001>

<bundles_post_ra>
// kernel: tpu_custom_call.1
= control target key start
LH: loop header
LB: loop body
LE: loop exit
PB: predicated region body
PF: predicated region fallthrough
CT: control target
= control target key end

     0   :  { %v169_v2 = vmov 0   ;;  %s227_s0 = inlined_call_operand.vmem [shape: s32[24,1], index: 0, kind: input, shape index: {}]   ;;  %s228_s1 = inlined_call_operand.vmem [shape: f32[16,128], index: 1, kind: input, shape index: {}]   ;;  %s229_s2 = inlined_call_operand.vmem [shape: f32[24,16], index: 2, kind: input, shape index: {}]   ;;  %s230_s3 = inlined_call_operand.hbm [shape: f32[24,128], index: 3, kind: output, shape index: {}]  }
   0x1   :  { %v24_v0 = vld [vmem:[%s227_s0 + $0x10] sm:$0xff]  ;;  %v23_v1 = vld [vmem:[%s227_s0 + $0x8] sm:$0xff]  ;;  %141 = vset.pattern.permute.xlu0 %v169_v2  ;;  %142 = vset.pattern.permute.xlu1 %v169_v2 }
   0x2   :  { %8 = vsyncpa [#allocation3], 0  ;;  %32 = vperm.xlu0 %141, %v24_v0   ;;  %29 = vperm.xlu1 %142, %v23_v1   ;;  %v22_v3 = vld [vmem:[%s227_s0] sm:$0xff]  ;;  %v16_v4 = vld [vmem:[%s228_s1 + $0x8] sm:$0xff]  ;;  %v17_v6 = vlaneseq  ;;  %vm43_vm0 = vcmask 130048   ;;  %v170_v10 = vmov 0.0  }
   0x3   :  { %133 = vmatpush.msra.mxu2 %v16_v4  ;;  %67 = vmatpush.msra.mxu0 %v16_v4  ;;  %v15_v5 = vld [vmem:[%s228_s1] sm:$0xff]  ;;  %v103_v15 = vld [vmem:[%s229_s2 + $0x8] sm:$0xff]  ;;  %s171_s22 = smov [#allocation2]   ;;  %s114_s26 = sshll.u32 %s230_s3, 4  ;;  %v104_v17 = vld [vmem:[%s229_s2 + $0x10] sm:$0xff]  ;;  %s115_s26 = int_to_ptr.hbm [resolvable:$true] %s114_s26 }
   0x4   :  { %132 = vmatpush.msra.mxu1 %v16_v4  ;;  %v18_v7 = vand.u32 127, %v17_v6  ;;  %s112_s23 = sshll.u32 %s171_s22, 4  ;;  %v102_v19 = vld [vmem:[%s229_s2] sm:$0xff]  ;;  %s172_s4 = smov 128   ;;  %s113_s23 = int_to_ptr.vmem [resolvable:$true] %s112_s23 }
   0x5   :  { %135 = vmatpush.msra.mxu2 %v15_v5  ;;  %68 = vmatpush.msra.mxu0 %v15_v5  ;;  %s173_s3 = smov 8  }
   0x6   :  { %134 = vmatpush.msra.mxu1 %v15_v5 }
   0xa   :  { %26 = vperm.xlu0 %141, %v22_v3  }
  0x74   :  { %v33_v8 = vpop.permute.xlu0 %32  ;;  %v30_v9 = vpop.permute.xlu1 %29 }
  0x75   :  { %vm36_vm1 = vcmp.eq.s32.totalorder %v18_v7, %v33_v8  ;;  %vm35_vm2 = vcmp.eq.s32.totalorder %v18_v7, %v30_v9 }
  0x76   :  { %v128_v11 = vsel %vm36_vm1, 1.0, %v170_v10  ;;  %v127_v12 = vsel %vm35_vm2, 1.0, %v170_v10 }
  0x77   :  { %131 = vmatmul.msk.f32.vlgmr.msra.gmra.mxu2 %vm43_vm0, %v128_v11  ;;  %130 = vmatmul.msk.f32.vlgmr.msra.gmra.mxu1 %vm43_vm0, %v127_v12 }
  0x7c   :  { %v27_v13 = vpop.permute.xlu0 %26 }
  0x7d   :  { %vm34_vm3 = vcmp.eq.s32.totalorder %v18_v7, %v27_v13 }
  0x7e   :  { %v126_v14 = vsel %vm34_vm3, 1.0, %v170_v10 }
  0x7f   :  { %129 = vmatmul.msk.f32.vlgmr.msra.gmra.mxu0 %vm43_vm0, %v126_v14 }
  0xf4   :  { %v73_v16 = vpop.f32.mrf.mxu1 }
  0xf5   :  { %84 = vst [vmem:[#allocation2 + $0x8] sm:$0xff] %v73_v16 }
  0xf6   :  { %106 = vst.msk [vmem:[#allocation2 + $0x8] sm:$0xff] %vm43_vm0, %v103_v15 }
  0xfa   :  { %v76_v18 = vpop.f32.mrf.mxu2 }
  0xfb   :  { %85 = vst [vmem:[#allocation2 + $0x10] sm:$0xff] %v76_v18 }
  0xfc   :  { %107 = vst.msk [vmem:[#allocation2 + $0x10] sm:$0xff] %vm43_vm0, %v104_v17  ;;  %v70_v20 = vpop.f32.mrf.mxu0 }
  0xfd   :  { %83 = vst [vmem:[#allocation2] sm:$0xff] %v70_v20 }
  0xfe   :  { %105 = vst.msk [vmem:[#allocation2] sm:$0xff] %vm43_vm0, %v102_v19 }
  0xff   :  { %120 = dma.vmem_to_hbm [thread:$0]  %s113_s23, 384, %s115_s26, [#allocation3], %s172_s4, %s172_s4, %s173_s3  }
 0x100   :  { %167 = dma.done.wait [#allocation3], 384  }
 0x101   :  { %168 = vsyncadd [#allocation3], 4294966912 }
 0x102   :  { %125 = vsyncpa [#allocation3], 1 }

</bundles_post_ra>
